<compile_context>
chip_gen: v5e
topology: v5e:2x2
jax: 0.10.0
libtpu: 0.0.40
codegen_flags: <defaults>
</compile_context>

<pallas_src>
import functools

import jax
import jax.numpy as jnp
from jax.experimental import pallas as pl
from jax.experimental.pallas import tpu as pltpu


def _make_rnn_classifier_kernel(num_layers: int):
    """Kernel: one time-block of the RNN recurrence (+ Linear head on last block)."""

    def kernel(*refs):
        # refs = [seq_ref (t_blk, B_pad, D_in),
        #         (w_l, b_l) * num_layers,      # fused [w_ih; w_hh], b_ih + b_hh
        #         w_ll, b_ll,
        #         out_ref (B_pad, C),
        #         h_scratch (num_layers, B_pad, H)]
        seq_ref = refs[0]
        layer_refs = refs[1 : 1 + 2 * num_layers]
        w_ll_ref, b_ll_ref, out_ref, h_scratch = refs[1 + 2 * num_layers :]

        t_blk = seq_ref.shape[0]
        t_idx = pl.program_id(0)

        # Zero the persistent hidden state at the first time block.
        @pl.when(t_idx == 0)
        def _():
            h_scratch[...] = jnp.zeros_like(h_scratch)

        # Hoist the (small) fused weights into values once per grid step.
        # NOTE: for large H (>=512) keep these as refs and let jnp.dot stream
        # from VMEM to avoid vreg spills.
        layer_w = [
            (layer_refs[2 * l][...], layer_refs[2 * l + 1][...])
            for l in range(num_layers)
        ]

        # Hidden state carried as values through the (fully unrolled) time loop.
        h0 = tuple(h_scratch[l] for l in range(num_layers))

        def step(i, hs):
            x = seq_ref[i]  # (B_pad, D_in) cheap leading-axis dynamic index
            new_hs = []
            for l in range(num_layers):
                w_l, b_l = layer_w[l]
                # Fused ih/hh matmul: one MXU push + one add + tanh per layer.
                xh = jnp.concatenate([x, hs[l]], axis=-1)
                h = jnp.tanh(
                    jnp.dot(xh, w_l, preferred_element_type=jnp.float32) + b_l
                )
                new_hs.append(h)
                x = h  # input to next layer
            return tuple(new_hs)

        hs = jax.lax.fori_loop(0, t_blk, step, h0, unroll=True)

        # Persist hidden state for the next time block.
        for l in range(num_layers):
            h_scratch[l] = hs[l]

        # Linear head on the last-layer hidden state at the final timestep.
        @pl.when(t_idx == pl.num_programs(0) - 1)
        def _():
            logits = (
                jnp.dot(hs[-1], w_ll_ref[...], preferred_element_type=jnp.float32)
                + b_ll_ref[...]
            )
            out_ref[...] = logits.astype(out_ref.dtype)

    return kernel


def _pick_time_block(T, B_pad, D_in, max_block_bytes=4 << 20):
    """Largest divisor of T (<=64) whose double-buffered seq block stays small."""
    per_step = B_pad * D_in * 4  # f32 bytes per timestep
    best = 1
    for tb in range(1, T + 1):
        if T % tb == 0 and tb <= 64 and 2 * tb * per_step <= max_block_bytes:
            best = tb
    return best


@functools.partial(jax.jit, static_argnames=("num_layers", "time_block"))
def rnn_classifier_forward(seq_btd, params, num_layers, time_block=None):
    """seq_btd: (B, T, D_in) float32, batch_first like PyTorch.

    params: dict with
      'w_ih_l{l}': (D_in_l, H)  (pre-transposed)
      'w_hh_l{l}': (H, H)       (pre-transposed)
      'b_ih_l{l}': (1, H)
      'b_hh_l{l}': (1, H)
      'w_ll':      (H, C)       (pre-transposed)
      'b_ll':      (1, C)
    """
    B, T, D_in = seq_btd.shape
    H = params["w_hh_l0"].shape[0]
    C = params["w_ll"].shape[1]

    # Pad batch to a sublane multiple (8) so vregs/MXU rows aren't mostly padding.
    B_pad = max(8, ((B + 7) // 8) * 8)
    seq = jnp.transpose(seq_btd, (1, 0, 2))  # time-major (T, B, D_in)
    if B_pad != B:
        seq = jnp.pad(seq, ((0, 0), (0, B_pad - B), (0, 0)))

    if time_block is None:
        time_block = _pick_time_block(T, B_pad, D_in)
    assert T % time_block == 0, (T, time_block)
    grid = (T // time_block,)

    # Fuse weights / biases wrapper-side (tiny, runs once under jit).
    inputs = [seq]
    for l in range(num_layers):
        w_l = jnp.concatenate(
            [params[f"w_ih_l{l}"], params[f"w_hh_l{l}"]], axis=0
        )  # (D_in_l + H, H)
        b_l = params[f"b_ih_l{l}"] + params[f"b_hh_l{l}"]  # (1, H)
        inputs += [w_l, b_l]
    inputs += [params["w_ll"], params["b_ll"]]

    def _full_spec(shape):
        n = len(shape)
        return pl.BlockSpec(shape, lambda t, _n=n: (0,) * _n)

    in_specs = [pl.BlockSpec((time_block, B_pad, D_in), lambda t: (t, 0, 0))]
    in_specs += [_full_spec(x.shape) for x in inputs[1:]]

    # TODO(synk): for large B on v7x, add a leading batch grid axis marked
    # "parallel" (per-core hidden scratch) so the two TensorCores split batch.
    out = pl.pallas_call(
        _make_rnn_classifier_kernel(num_layers),
        out_shape=jax.ShapeDtypeStruct((B_pad, C), jnp.float32),
        grid=grid,
        in_specs=in_specs,
        out_specs=pl.BlockSpec((B_pad, C), lambda t: (0, 0)),
        scratch_shapes=[pltpu.VMEM((num_layers, B_pad, H), jnp.float32)],
        compiler_params=pltpu.CompilerParams(
            dimension_semantics=("arbitrary",),  # serial recurrence over time
            vmem_limit_bytes=32 * 1024 * 1024,   # fits v5e/v6e/v7x budgets
        ),
    )(*inputs)
    return out[:B]


def init_params(key, dim_input, dim_hidden, num_layers, num_classes):
    """Deterministic init mirroring nn.RNN / nn.Linear parameter shapes.

    PyTorch stores weight_ih_l{l} as (H, D_in_l) and weight_hh_l{l} as (H, H);
    we store them pre-transposed for the kernel's (x @ W) convention.
    """
    params = {}
    k = 1.0 / jnp.sqrt(dim_hidden)
    for l in range(num_layers):
        d_in = dim_input if l == 0 else dim_hidden
        key, k1, k2, k3, k4 = jax.random.split(key, 5)
        params[f"w_ih_l{l}"] = jax.random.uniform(
            k1, (d_in, dim_hidden), jnp.float32, -k, k
        )
        params[f"w_hh_l{l}"] = jax.random.uniform(
            k2, (dim_hidden, dim_hidden), jnp.float32, -k, k
        )
        params[f"b_ih_l{l}"] = jax.random.uniform(
            k3, (1, dim_hidden), jnp.float32, -k, k
        )
        params[f"b_hh_l{l}"] = jax.random.uniform(
            k4, (1, dim_hidden), jnp.float32, -k, k
        )
    key, k1, k2 = jax.random.split(key, 3)
    kl = 1.0 / jnp.sqrt(dim_hidden)
    params["w_ll"] = jax.random.uniform(
        k1, (dim_hidden, num_classes), jnp.float32, -kl, kl
    )
    params["b_ll"] = jax.random.uniform(k2, (1, num_classes), jnp.float32, -kl, kl)
    return params


def reference_forward(seq_btd, params, num_layers):
    """Pure-JAX reference of the PyTorch forward (unfused, f32)."""
    B, T, _ = seq_btd.shape
    H = params["w_hh_l0"].shape[0]
    hs = [jnp.zeros((B, H), jnp.float32) for _ in range(num_layers)]
    last = None
    for t in range(T):
        x = seq_btd[:, t, :]
        for l in range(num_layers):
            h = jnp.tanh(
                x @ params[f"w_ih_l{l}"] + params[f"b_ih_l{l}"]
                + hs[l] @ params[f"w_hh_l{l}"] + params[f"b_hh_l{l}"]
            )
            hs[l] = h
            x = h
        last = hs[-1]
    return last @ params["w_ll"] + params["b_ll"]


if __name__ == "__main__":
    # cfg: rnn.input=16, rnn.hidden=32, rnn.num_layers=2, system.num_classes=4
    B, T = 2, 8
    DIM_INPUT, DIM_HIDDEN, NUM_LAYERS, NUM_CLASSES = 16, 32, 2, 4

    key = jax.random.PRNGKey(0)
    key, k_seq, k_par = jax.random.split(key, 3)
    seq = jax.random.normal(k_seq, (B, T, DIM_INPUT), jnp.float32)
    params = init_params(k_par, DIM_INPUT, DIM_HIDDEN, NUM_LAYERS, NUM_CLASSES)

    ref = reference_forward(seq, params, NUM_LAYERS)

    # Default: whole sequence in one time block (grid=(1,)).
    out = jax.block_until_ready(rnn_classifier_forward(seq, params, NUM_LAYERS))
    assert out.shape == (B, NUM_CLASSES), out.shape
    assert jnp.allclose(out, ref, atol=1e-3, rtol=1e-3), (out, ref)

    # Multi-block path: hidden state carried across grid steps in VMEM scratch.
    out2 = jax.block_until_ready(
        rnn_classifier_forward(seq, params, NUM_LAYERS, time_block=4)
    )
    assert jnp.allclose(out2, ref, atol=1e-3, rtol=1e-3), (out2, ref)

    print("KERNEL_OK")
</pallas_src>

<mosaic_0001>
module attributes {stable_mosaic.version = 11 : i64} {
  func.func @kernel(%arg0: i32, %arg1: memref<8x8x16xf32, #tpu.memory_space<vmem>>, %arg2: memref<48x32xf32, #tpu.memory_space<vmem>>, %arg3: memref<1x32xf32, #tpu.memory_space<vmem>>, %arg4: memref<64x32xf32, #tpu.memory_space<vmem>>, %arg5: memref<1x32xf32, #tpu.memory_space<vmem>>, %arg6: memref<32x4xf32, #tpu.memory_space<vmem>>, %arg7: memref<1x4xf32, #tpu.memory_space<vmem>>, %arg8: memref<8x4xf32, #tpu.memory_space<vmem>>, %arg9: memref<2x8x32xf32, #tpu.memory_space<vmem>>) attributes {dimension_semantics = [#tpu.dimension_semantics<arbitrary>], iteration_bounds = array<i64: 1>, scalar_prefetch = 0 : i64, scratch_operands = 1 : i64, tpu.core_type = #tpu.core_type<tc>, window_params = [{transform_indices = @transform_0, window_bounds = array<i64: 8, 8, 16>}, {pipeline_mode = #tpu.pipeline_mode<synchronous>, transform_indices = @transform_1, window_bounds = array<i64: 48, 32>}, {pipeline_mode = #tpu.pipeline_mode<synchronous>, transform_indices = @transform_2, window_bounds = array<i64: 1, 32>}, {pipeline_mode = #tpu.pipeline_mode<synchronous>, transform_indices = @transform_3, window_bounds = array<i64: 64, 32>}, {pipeline_mode = #tpu.pipeline_mode<synchronous>, transform_indices = @transform_4, window_bounds = array<i64: 1, 32>}, {pipeline_mode = #tpu.pipeline_mode<synchronous>, transform_indices = @transform_5, window_bounds = array<i64: 32, 4>}, {pipeline_mode = #tpu.pipeline_mode<synchronous>, transform_indices = @transform_6, window_bounds = array<i64: 1, 4>}, {pipeline_mode = #tpu.pipeline_mode<synchronous>, transform_indices = @transform_7, window_bounds = array<i64: 8, 4>}]} {
    %c0_i32 = arith.constant 0 : i32
    %0 = arith.cmpi eq, %arg0, %c0_i32 : i32
    %1 = arith.extui %0 : i1 to i32
    %c0_i32_0 = arith.constant 0 : i32
    %2 = arith.cmpi ne, %1, %c0_i32_0 : i32
    scf.if %2 {
      %cst_53 = arith.constant 0.000000e+00 : f32
      %124 = vector.broadcast %cst_53 : f32 to vector<2x8x32xf32>
      %c0_54 = arith.constant 0 : index
      %c0_55 = arith.constant 0 : index
      %c0_56 = arith.constant 0 : index
      %125 = vector.load %arg9[%c0_54, %c0_55, %c0_56] : memref<2x8x32xf32, #tpu.memory_space<vmem>>, vector<2x8x32xf32>
      tpu.vector_store %arg9[%c0_54, %c0_55, %c0_56], %124 {strides = array<i32>} : memref<2x8x32xf32, #tpu.memory_space<vmem>>, vector<2x8x32xf32>,
    } else {
    }
    %c0 = arith.constant 0 : index
    %c0_1 = arith.constant 0 : index
    %3 = vector.load %arg2[%c0, %c0_1] : memref<48x32xf32, #tpu.memory_space<vmem>>, vector<48x32xf32>
    %c0_2 = arith.constant 0 : index
    %c0_3 = arith.constant 0 : index
    %4 = vector.load %arg3[%c0_2, %c0_3] : memref<1x32xf32, #tpu.memory_space<vmem>>, vector<1x32xf32>
    %c0_4 = arith.constant 0 : index
    %c0_5 = arith.constant 0 : index
    %5 = vector.load %arg4[%c0_4, %c0_5] : memref<64x32xf32, #tpu.memory_space<vmem>>, vector<64x32xf32>
    %c0_6 = arith.constant 0 : index
    %c0_7 = arith.constant 0 : index
    %6 = vector.load %arg5[%c0_6, %c0_7] : memref<1x32xf32, #tpu.memory_space<vmem>>, vector<1x32xf32>
    %c0_8 = arith.constant 0 : index
    %c0_9 = arith.constant 0 : index
    %c0_10 = arith.constant 0 : index
    %7 = vector.load %arg9[%c0_8, %c0_9, %c0_10] : memref<2x8x32xf32, #tpu.memory_space<vmem>>, vector<1x8x32xf32>
    %8 = vector.shape_cast %7 : vector<1x8x32xf32> to vector<8x32xf32>
    %c1 = arith.constant 1 : index
    %c0_11 = arith.constant 0 : index
    %c0_12 = arith.constant 0 : index
    %9 = vector.load %arg9[%c1, %c0_11, %c0_12] : memref<2x8x32xf32, #tpu.memory_space<vmem>>, vector<1x8x32xf32>
    %10 = vector.shape_cast %9 : vector<1x8x32xf32> to vector<8x32xf32>
    %c0_i32_13 = arith.constant 0 : i32
    %11 = arith.index_cast %c0_i32_13 : i32 to index
    %c0_14 = arith.constant 0 : index
    %c0_15 = arith.constant 0 : index
    %12 = vector.load %arg1[%11, %c0_14, %c0_15] : memref<8x8x16xf32, #tpu.memory_space<vmem>>, vector<1x8x16xf32>
    %13 = vector.shape_cast %12 : vector<1x8x16xf32> to vector<8x16xf32>
    %14 = tpu.concatenate %13, %8 in 1 : vector<8x16xf32>, vector<8x32xf32> -> vector<8x48xf32>
    %cst = arith.constant dense<0.000000e+00> : vector<8x32xf32>
    %15 = tpu.matmul %14, %3, %cst {dimension_numbers = #tpu.dot_dimension_numbers<[1], [0], [0], [1], [0, 0, 1, 1], [], []>} : vector<8x48xf32>, vector<48x32xf32>, vector<8x32xf32> -> vector<8x32xf32>
    %16 = vector.broadcast %4 : vector<1x32xf32> to vector<8x32xf32>
    %17 = arith.addf %15, %16 : vector<8x32xf32>
    %18 = math.tanh %17 : vector<8x32xf32>
    %19 = tpu.concatenate %18, %10 in 1 : vector<8x32xf32>, vector<8x32xf32> -> vector<8x64xf32>
    %cst_16 = arith.constant dense<0.000000e+00> : vector<8x32xf32>
    %20 = tpu.matmul %19, %5, %cst_16 {dimension_numbers = #tpu.dot_dimension_numbers<[1], [0], [0], [1], [0, 0, 1, 1], [], []>} : vector<8x64xf32>, vector<64x32xf32>, vector<8x32xf32> -> vector<8x32xf32>
    %21 = vector.broadcast %6 : vector<1x32xf32> to vector<8x32xf32>
    %22 = arith.addf %20, %21 : vector<8x32xf32>
    %23 = math.tanh %22 : vector<8x32xf32>
    %c1_i32 = arith.constant 1 : i32
    %24 = arith.index_cast %c1_i32 : i32 to index
    %c0_17 = arith.constant 0 : index
    %c0_18 = arith.constant 0 : index
    %25 = vector.load %arg1[%24, %c0_17, %c0_18] : memref<8x8x16xf32, #tpu.memory_space<vmem>>, vector<1x8x16xf32>
    %26 = vector.shape_cast %25 : vector<1x8x16xf32> to vector<8x16xf32>
    %27 = tpu.concatenate %26, %18 in 1 : vector<8x16xf32>, vector<8x32xf32> -> vector<8x48xf32>
    %cst_19 = arith.constant dense<0.000000e+00> : vector<8x32xf32>
    %28 = tpu.matmul %27, %3, %cst_19 {dimension_numbers = #tpu.dot_dimension_numbers<[1], [0], [0], [1], [0, 0, 1, 1], [], []>} : vector<8x48xf32>, vector<48x32xf32>, vector<8x32xf32> -> vector<8x32xf32>
    %29 = vector.broadcast %4 : vector<1x32xf32> to vector<8x32xf32>
    %30 = arith.addf %28, %29 : vector<8x32xf32>
    %31 = math.tanh %30 : vector<8x32xf32>
    %32 = tpu.concatenate %31, %23 in 1 : vector<8x32xf32>, vector<8x32xf32> -> vector<8x64xf32>
    %cst_20 = arith.constant dense<0.000000e+00> : vector<8x32xf32>
    %33 = tpu.matmul %32, %5, %cst_20 {dimension_numbers = #tpu.dot_dimension_numbers<[1], [0], [0], [1], [0, 0, 1, 1], [], []>} : vector<8x64xf32>, vector<64x32xf32>, vector<8x32xf32> -> vector<8x32xf32>
    %34 = vector.broadcast %6 : vector<1x32xf32> to vector<8x32xf32>
    %35 = arith.addf %33, %34 : vector<8x32xf32>
    %36 = math.tanh %35 : vector<8x32xf32>
    %c2_i32 = arith.constant 2 : i32
    %37 = arith.index_cast %c2_i32 : i32 to index
    %c0_21 = arith.constant 0 : index
    %c0_22 = arith.constant 0 : index
    %38 = vector.load %arg1[%37, %c0_21, %c0_22] : memref<8x8x16xf32, #tpu.memory_space<vmem>>, vector<1x8x16xf32>
    %39 = vector.shape_cast %38 : vector<1x8x16xf32> to vector<8x16xf32>
    %40 = tpu.concatenate %39, %31 in 1 : vector<8x16xf32>, vector<8x32xf32> -> vector<8x48xf32>
    %cst_23 = arith.constant dense<0.000000e+00> : vector<8x32xf32>
    %41 = tpu.matmul %40, %3, %cst_23 {dimension_numbers = #tpu.dot_dimension_numbers<[1], [0], [0], [1], [0, 0, 1, 1], [], []>} : vector<8x48xf32>, vector<48x32xf32>, vector<8x32xf32> -> vector<8x32xf32>
    %42 = vector.broadcast %4 : vector<1x32xf32> to vector<8x32xf32>
    %43 = arith.addf %41, %42 : vector<8x32xf32>
    %44 = math.tanh %43 : vector<8x32xf32>
    %45 = tpu.concatenate %44, %36 in 1 : vector<8x32xf32>, vector<8x32xf32> -> vector<8x64xf32>
    %cst_24 = arith.constant dense<0.000000e+00> : vector<8x32xf32>
    %46 = tpu.matmul %45, %5, %cst_24 {dimension_numbers = #tpu.dot_dimension_numbers<[1], [0], [0], [1], [0, 0, 1, 1], [], []>} : vector<8x64xf32>, vector<64x32xf32>, vector<8x32xf32> -> vector<8x32xf32>
    %47 = vector.broadcast %6 : vector<1x32xf32> to vector<8x32xf32>
    %48 = arith.addf %46, %47 : vector<8x32xf32>
    %49 = math.tanh %48 : vector<8x32xf32>
    %c3_i32 = arith.constant 3 : i32
    %50 = arith.index_cast %c3_i32 : i32 to index
    %c0_25 = arith.constant 0 : index
    %c0_26 = arith.constant 0 : index
    %51 = vector.load %arg1[%50, %c0_25, %c0_26] : memref<8x8x16xf32, #tpu.memory_space<vmem>>, vector<1x8x16xf32>
    %52 = vector.shape_cast %51 : vector<1x8x16xf32> to vector<8x16xf32>
    %53 = tpu.concatenate %52, %44 in 1 : vector<8x16xf32>, vector<8x32xf32> -> vector<8x48xf32>
    %cst_27 = arith.constant dense<0.000000e+00> : vector<8x32xf32>
    %54 = tpu.matmul %53, %3, %cst_27 {dimension_numbers = #tpu.dot_dimension_numbers<[1], [0], [0], [1], [0, 0, 1, 1], [], []>} : vector<8x48xf32>, vector<48x32xf32>, vector<8x32xf32> -> vector<8x32xf32>
    %55 = vector.broadcast %4 : vector<1x32xf32> to vector<8x32xf32>
    %56 = arith.addf %54, %55 : vector<8x32xf32>
    %57 = math.tanh %56 : vector<8x32xf32>
    %58 = tpu.concatenate %57, %49 in 1 : vector<8x32xf32>, vector<8x32xf32> -> vector<8x64xf32>
    %cst_28 = arith.constant dense<0.000000e+00> : vector<8x32xf32>
    %59 = tpu.matmul %58, %5, %cst_28 {dimension_numbers = #tpu.dot_dimension_numbers<[1], [0], [0], [1], [0, 0, 1, 1], [], []>} : vector<8x64xf32>, vector<64x32xf32>, vector<8x32xf32> -> vector<8x32xf32>
    %60 = vector.broadcast %6 : vector<1x32xf32> to vector<8x32xf32>
    %61 = arith.addf %59, %60 : vector<8x32xf32>
    %62 = math.tanh %61 : vector<8x32xf32>
    %c4_i32 = arith.constant 4 : i32
    %63 = arith.index_cast %c4_i32 : i32 to index
    %c0_29 = arith.constant 0 : index
    %c0_30 = arith.constant 0 : index
    %64 = vector.load %arg1[%63, %c0_29, %c0_30] : memref<8x8x16xf32, #tpu.memory_space<vmem>>, vector<1x8x16xf32>
    %65 = vector.shape_cast %64 : vector<1x8x16xf32> to vector<8x16xf32>
    %66 = tpu.concatenate %65, %57 in 1 : vector<8x16xf32>, vector<8x32xf32> -> vector<8x48xf32>
    %cst_31 = arith.constant dense<0.000000e+00> : vector<8x32xf32>
    %67 = tpu.matmul %66, %3, %cst_31 {dimension_numbers = #tpu.dot_dimension_numbers<[1], [0], [0], [1], [0, 0, 1, 1], [], []>} : vector<8x48xf32>, vector<48x32xf32>, vector<8x32xf32> -> vector<8x32xf32>
    %68 = vector.broadcast %4 : vector<1x32xf32> to vector<8x32xf32>
    %69 = arith.addf %67, %68 : vector<8x32xf32>
    %70 = math.tanh %69 : vector<8x32xf32>
    %71 = tpu.concatenate %70, %62 in 1 : vector<8x32xf32>, vector<8x32xf32> -> vector<8x64xf32>
    %cst_32 = arith.constant dense<0.000000e+00> : vector<8x32xf32>
    %72 = tpu.matmul %71, %5, %cst_32 {dimension_numbers = #tpu.dot_dimension_numbers<[1], [0], [0], [1], [0, 0, 1, 1], [], []>} : vector<8x64xf32>, vector<64x32xf32>, vector<8x32xf32> -> vector<8x32xf32>
    %73 = vector.broadcast %6 : vector<1x32xf32> to vector<8x32xf32>
    %74 = arith.addf %72, %73 : vector<8x32xf32>
    %75 = math.tanh %74 : vector<8x32xf32>
    %c5_i32 = arith.constant 5 : i32
    %76 = arith.index_cast %c5_i32 : i32 to index
    %c0_33 = arith.constant 0 : index
    %c0_34 = arith.constant 0 : index
    %77 = vector.load %arg1[%76, %c0_33, %c0_34] : memref<8x8x16xf32, #tpu.memory_space<vmem>>, vector<1x8x16xf32>
    %78 = vector.shape_cast %77 : vector<1x8x16xf32> to vector<8x16xf32>
    %79 = tpu.concatenate %78, %70 in 1 : vector<8x16xf32>, vector<8x32xf32> -> vector<8x48xf32>
    %cst_35 = arith.constant dense<0.000000e+00> : vector<8x32xf32>
    %80 = tpu.matmul %79, %3, %cst_35 {dimension_numbers = #tpu.dot_dimension_numbers<[1], [0], [0], [1], [0, 0, 1, 1], [], []>} : vector<8x48xf32>, vector<48x32xf32>, vector<8x32xf32> -> vector<8x32xf32>
    %81 = vector.broadcast %4 : vector<1x32xf32> to vector<8x32xf32>
    %82 = arith.addf %80, %81 : vector<8x32xf32>
    %83 = math.tanh %82 : vector<8x32xf32>
    %84 = tpu.concatenate %83, %75 in 1 : vector<8x32xf32>, vector<8x32xf32> -> vector<8x64xf32>
    %cst_36 = arith.constant dense<0.000000e+00> : vector<8x32xf32>
    %85 = tpu.matmul %84, %5, %cst_36 {dimension_numbers = #tpu.dot_dimension_numbers<[1], [0], [0], [1], [0, 0, 1, 1], [], []>} : vector<8x64xf32>, vector<64x32xf32>, vector<8x32xf32> -> vector<8x32xf32>
    %86 = vector.broadcast %6 : vector<1x32xf32> to vector<8x32xf32>
    %87 = arith.addf %85, %86 : vector<8x32xf32>
    %88 = math.tanh %87 : vector<8x32xf32>
    %c6_i32 = arith.constant 6 : i32
    %89 = arith.index_cast %c6_i32 : i32 to index
    %c0_37 = arith.constant 0 : index
    %c0_38 = arith.constant 0 : index
    %90 = vector.load %arg1[%89, %c0_37, %c0_38] : memref<8x8x16xf32, #tpu.memory_space<vmem>>, vector<1x8x16xf32>
    %91 = vector.shape_cast %90 : vector<1x8x16xf32> to vector<8x16xf32>
    %92 = tpu.concatenate %91, %83 in 1 : vector<8x16xf32>, vector<8x32xf32> -> vector<8x48xf32>
    %cst_39 = arith.constant dense<0.000000e+00> : vector<8x32xf32>
    %93 = tpu.matmul %92, %3, %cst_39 {dimension_numbers = #tpu.dot_dimension_numbers<[1], [0], [0], [1], [0, 0, 1, 1], [], []>} : vector<8x48xf32>, vector<48x32xf32>, vector<8x32xf32> -> vector<8x32xf32>
    %94 = vector.broadcast %4 : vector<1x32xf32> to vector<8x32xf32>
    %95 = arith.addf %93, %94 : vector<8x32xf32>
    %96 = math.tanh %95 : vector<8x32xf32>
    %97 = tpu.concatenate %96, %88 in 1 : vector<8x32xf32>, vector<8x32xf32> -> vector<8x64xf32>
    %cst_40 = arith.constant dense<0.000000e+00> : vector<8x32xf32>
    %98 = tpu.matmul %97, %5, %cst_40 {dimension_numbers = #tpu.dot_dimension_numbers<[1], [0], [0], [1], [0, 0, 1, 1], [], []>} : vector<8x64xf32>, vector<64x32xf32>, vector<8x32xf32> -> vector<8x32xf32>
    %99 = vector.broadcast %6 : vector<1x32xf32> to vector<8x32xf32>
    %100 = arith.addf %98, %99 : vector<8x32xf32>
    %101 = math.tanh %100 : vector<8x32xf32>
    %c7_i32 = arith.constant 7 : i32
    %102 = arith.index_cast %c7_i32 : i32 to index
    %c0_41 = arith.constant 0 : index
    %c0_42 = arith.constant 0 : index
    %103 = vector.load %arg1[%102, %c0_41, %c0_42] : memref<8x8x16xf32, #tpu.memory_space<vmem>>, vector<1x8x16xf32>
    %104 = vector.shape_cast %103 : vector<1x8x16xf32> to vector<8x16xf32>
    %105 = tpu.concatenate %104, %96 in 1 : vector<8x16xf32>, vector<8x32xf32> -> vector<8x48xf32>
    %cst_43 = arith.constant dense<0.000000e+00> : vector<8x32xf32>
    %106 = tpu.matmul %105, %3, %cst_43 {dimension_numbers = #tpu.dot_dimension_numbers<[1], [0], [0], [1], [0, 0, 1, 1], [], []>} : vector<8x48xf32>, vector<48x32xf32>, vector<8x32xf32> -> vector<8x32xf32>
    %107 = vector.broadcast %4 : vector<1x32xf32> to vector<8x32xf32>
    %108 = arith.addf %106, %107 : vector<8x32xf32>
    %109 = math.tanh %108 : vector<8x32xf32>
    %110 = tpu.concatenate %109, %101 in 1 : vector<8x32xf32>, vector<8x32xf32> -> vector<8x64xf32>
    %cst_44 = arith.constant dense<0.000000e+00> : vector<8x32xf32>
    %111 = tpu.matmul %110, %5, %cst_44 {dimension_numbers = #tpu.dot_dimension_numbers<[1], [0], [0], [1], [0, 0, 1, 1], [], []>} : vector<8x64xf32>, vector<64x32xf32>, vector<8x32xf32> -> vector<8x32xf32>
    %112 = vector.broadcast %6 : vector<1x32xf32> to vector<8x32xf32>
    %113 = arith.addf %111, %112 : vector<8x32xf32>
    %114 = math.tanh %113 : vector<8x32xf32>
    %c8_i32 = arith.constant 8 : i32
    %c0_45 = arith.constant 0 : index
    %c0_46 = arith.constant 0 : index
    %c0_47 = arith.constant 0 : index
    %115 = vector.load %arg9[%c0_45, %c0_46, %c0_47] : memref<2x8x32xf32, #tpu.memory_space<vmem>>, vector<1x8x32xf32>
    %116 = vector.shape_cast %115 : vector<1x8x32xf32> to vector<8x32xf32>
    %117 = vector.shape_cast %109 : vector<8x32xf32> to vector<1x8x32xf32>
    tpu.vector_store %arg9[%c0_45, %c0_46, %c0_47], %117 {strides = array<i32>} : memref<2x8x32xf32, #tpu.memory_space<vmem>>, vector<1x8x32xf32>,
    %c1_48 = arith.constant 1 : index
    %c0_49 = arith.constant 0 : index
    %c0_50 = arith.constant 0 : index
    %118 = vector.load %arg9[%c1_48, %c0_49, %c0_50] : memref<2x8x32xf32, #tpu.memory_space<vmem>>, vector<1x8x32xf32>
    %119 = vector.shape_cast %118 : vector<1x8x32xf32> to vector<8x32xf32>
    %120 = vector.shape_cast %114 : vector<8x32xf32> to vector<1x8x32xf32>
    tpu.vector_store %arg9[%c1_48, %c0_49, %c0_50], %120 {strides = array<i32>} : memref<2x8x32xf32, #tpu.memory_space<vmem>>, vector<1x8x32xf32>,
    %c0_i32_51 = arith.constant 0 : i32
    %121 = arith.cmpi eq, %arg0, %c0_i32_51 : i32
    %122 = arith.extui %121 : i1 to i32
    %c0_i32_52 = arith.constant 0 : i32
    %123 = arith.cmpi ne, %122, %c0_i32_52 : i32
    scf.if %123 {
      %c0_53 = arith.constant 0 : index
      %c0_54 = arith.constant 0 : index
      %124 = vector.load %arg6[%c0_53, %c0_54] : memref<32x4xf32, #tpu.memory_space<vmem>>, vector<32x4xf32>
      %cst_55 = arith.constant dense<0.000000e+00> : vector<8x4xf32>
      %125 = tpu.matmul %114, %124, %cst_55 {dimension_numbers = #tpu.dot_dimension_numbers<[1], [0], [0], [1], [0, 0, 1, 1], [], []>} : vector<8x32xf32>, vector<32x4xf32>, vector<8x4xf32> -> vector<8x4xf32>
      %c0_56 = arith.constant 0 : index
      %c0_57 = arith.constant 0 : index
      %126 = vector.load %arg7[%c0_56, %c0_57] : memref<1x4xf32, #tpu.memory_space<vmem>>, vector<1x4xf32>
      %127 = vector.broadcast %126 : vector<1x4xf32> to vector<8x4xf32>
      %128 = arith.addf %125, %127 : vector<8x4xf32>
      %c0_58 = arith.constant 0 : index
      %c0_59 = arith.constant 0 : index
      %129 = vector.load %arg8[%c0_58, %c0_59] : memref<8x4xf32, #tpu.memory_space<vmem>>, vector<8x4xf32>
      tpu.vector_store %arg8[%c0_58, %c0_59], %128 {strides = array<i32>} : memref<8x4xf32, #tpu.memory_space<vmem>>, vector<8x4xf32>,
    } else {
    }
    return
  }
  func.func @transform_0(%arg0: i32) -> (i32, i32, i32) {
    %c0_i32 = arith.constant 0 : i32
    %c0_i32_0 = arith.constant 0 : i32
    %c0_i32_1 = arith.constant 0 : i32
    return %arg0, %c0_i32, %c0_i32_0 : i32, i32, i32
  }
  func.func @transform_1(%arg0: i32) -> (i32, i32) {
    %c0_i32 = arith.constant 0 : i32
    %c0_i32_0 = arith.constant 0 : i32
    %c0_i32_1 = arith.constant 0 : i32
    return %c0_i32, %c0_i32_0 : i32, i32
  }
  func.func @transform_2(%arg0: i32) -> (i32, i32) {
    %c0_i32 = arith.constant 0 : i32
    %c0_i32_0 = arith.constant 0 : i32
    %c0_i32_1 = arith.constant 0 : i32
    return %c0_i32, %c0_i32_0 : i32, i32
  }
  func.func @transform_3(%arg0: i32) -> (i32, i32) {
    %c0_i32 = arith.constant 0 : i32
    %c0_i32_0 = arith.constant 0 : i32
    %c0_i32_1 = arith.constant 0 : i32
    return %c0_i32, %c0_i32_0 : i32, i32
  }
  func.func @transform_4(%arg0: i32) -> (i32, i32) {
    %c0_i32 = arith.constant 0 : i32
    %c0_i32_0 = arith.constant 0 : i32
    %c0_i32_1 = arith.constant 0 : i32
    return %c0_i32, %c0_i32_0 : i32, i32
  }
  func.func @transform_5(%arg0: i32) -> (i32, i32) {
    %c0_i32 = arith.constant 0 : i32
    %c0_i32_0 = arith.constant 0 : i32
    %c0_i32_1 = arith.constant 0 : i32
    return %c0_i32, %c0_i32_0 : i32, i32
  }
  func.func @transform_6(%arg0: i32) -> (i32, i32) {
    %c0_i32 = arith.constant 0 : i32
    %c0_i32_0 = arith.constant 0 : i32
    %c0_i32_1 = arith.constant 0 : i32
    return %c0_i32, %c0_i32_0 : i32, i32
  }
  func.func @transform_7(%arg0: i32) -> (i32, i32) {
    %c0_i32 = arith.constant 0 : i32
    %c0_i32_0 = arith.constant 0 : i32
    %c0_i32_1 = arith.constant 0 : i32
    return %c0_i32, %c0_i32_0 : i32, i32
  }
}

</mosaic_0001>

<bundles_post_ra>
// kernel: rnn_classifier_forward.1
= control target key start
LH: loop header
LB: loop body
LE: loop exit
PB: predicated region body
PF: predicated region fallthrough
CT: control target
= control target key end

     0   :  { %vm30_vm0 = vcmask 261120   ;;  %v645_v0 = vmov 0.0   ;;  %s646_s11 = smov 16   ;;  %s647_s18 = smov 32   ;;  %vm57_vm1 = vcmask 130048   ;;  %vm62_vm2 = vcmask 392192   ;;  %s991_s1 = inlined_call_operand.vmem [shape: f32[48,32], index: 1, kind: input, shape index: {}]   ;;  %s992_s2 = inlined_call_operand.vmem [shape: f32[1,32], index: 2, kind: input, shape index: {}]   ;;  %s993_s3 = inlined_call_operand.vmem [shape: f32[64,32], index: 3, kind: input, shape index: {}]   ;;  %s994_s0 = inlined_call_operand.vmem [shape: f32[8,8,16], index: 0, kind: input, shape index: {}]   ;;  %s995_s4 = inlined_call_operand.vmem [shape: f32[1,32], index: 4, kind: input, shape index: {}]   ;;  %s996_s6 = inlined_call_operand.vmem [shape: f32[1,4], index: 6, kind: input, shape index: {}]   ;;  %s997_s5 = inlined_call_operand.vmem [shape: f32[32,4], index: 5, kind: input, shape index: {}]   ;;  %s998_s7 = inlined_call_operand.vmem [shape: f32[8,4], index: 7, kind: output, shape index: {}]  }
   0x1   :  { %31 = vst.msk [vmem:[#allocation2] sm:$0xff] %vm30_vm0, %v645_v0  ;;  %v692_v1 = vld [vmem:[%s991_s1 + $0x28] sm:$0xff]  ;;  %v697_v2 = vld [vmem:[%s991_s1 + $0x20] sm:$0xff]  ;;  %v705_v3 = vld [vmem:[%s991_s1 + $0x18] sm:$0xff]  ;;  %vm96_vm3 = vcmask 523264   ;;  %vm577_vm4 = vcmask 31744  }
   0x2   :  { %32 = vst.msk [vmem:[#allocation2 + $0x8] sm:$0xff] %vm30_vm0, %v645_v0  ;;  %76 = vmatpush.msra.mxu0 %v692_v1  ;;  %141 = vmatpush.msra.mxu2 %v692_v1  ;;  %v712_v4 = vld [vmem:[%s991_s1 + $0x10] sm:$0xff]  ;;  %v719_v5 = vld [vmem:[%s991_s1 + $0x8] sm:$0xff]  ;;  %v729_v7 = vld [vmem:[%s991_s1] sm:$0xff] }
   0x3   :  { %v736_v9 = vld [vmem:[%s993_s3 + $0x38] sm:$0xff]  ;;  %v741_v10 = vld [vmem:[%s993_s3 + $0x30] sm:$0xff]  ;;  %v52_v11 = vld [vmem:[%s994_s0] sm:$0xff] }
   0x4   :  { %77 = vmatpush.msra.mxu0 %v697_v2  ;;  %142 = vmatpush.msra.mxu2 %v697_v2  ;;  %v770_v14 = vld [vmem:[%s993_s3 + $0x28] sm:$0xff]  ;;  %v777_v15 = vld [vmem:[%s993_s3 + $0x20] sm:$0xff]  ;;  %v785_v16 = vld [vmem:[%s993_s3 + $0x18] sm:$0xff] }
   0x5   :  { %108 = vmatpush.msra.mxu1 %v736_v9  ;;  %168 = vmatpush.msra.mxu3 %v736_v9  ;;  %v790_v17 = vld [vmem:[%s993_s3 + $0x10] sm:$0xff]  ;;  %v798_v18 = vld [vmem:[%s993_s3 + $0x8] sm:$0xff]  ;;  %v806_v19 = vld [vmem:[%s993_s3] sm:$0xff] }
   0x6   :  { %78 = vmatpush.msra.mxu0 %v705_v3  ;;  %143 = vmatpush.msra.mxu2 %v705_v3  ;;  %v832_v20 = vld [vmem:[%s992_s2] ss:$0 sm:$0xff]  ;;  %v585_v26 = vld [vmem:[%s994_s0 + $0x8] sm:$0xff]  ;;  %v588_v38 = vld [vmem:[%s994_s0 + $0x10] sm:$0xff] }
   0x7   :  { %109 = vmatpush.msra.mxu1 %v741_v10  ;;  %169 = vmatpush.msra.mxu3 %v741_v10  ;;  %v857_v29 = vld [vmem:[%s995_s4] ss:$0 sm:$0xff]  ;;  %v591_v49 = vld [vmem:[%s994_s0 + $0x18] sm:$0xff] }
   0x8   :  { %v49_v6 = vld [vmem:[#allocation2] sm:$0xff]  ;;  %79 = vmatpush.msra.mxu0 %v712_v4  ;;  %144 = vmatpush.msra.mxu2 %v712_v4 }
   0x9   :  { %54 = vrot.lane.b32.xlu0 %v49_v6, %s646_s11  ;;  %v51_v8 = vld [vmem:[#allocation2 + $0x8] sm:$0xff]  ;;  %110 = vmatpush.msra.mxu1 %v770_v14  ;;  %v594_v60 = vld [vmem:[%s994_s0 + $0x20] sm:$0xff] }
   0xa   :  { %80 = vmatpush.msra.mxu0 %v719_v5  ;;  %145 = vmatpush.msra.mxu2 %v719_v5 }
   0xb   :  { %170 = vmatpush.msra.mxu3 %v770_v14  ;;  %111 = vmatpush.msra.mxu1 %v777_v15 }
   0xc   :  { %81 = vmatpush.msra.mxu0 %v729_v7  ;;  %146 = vmatpush.msra.mxu2 %v729_v7 }
   0xd   :  { %171 = vmatpush.msra.mxu3 %v777_v15  ;;  %112 = vmatpush.msra.mxu1 %v785_v16 }
   0xe   :  { %201 = vmatpush.msrb.mxu0 %v692_v1  ;;  %228 = vmatpush.msrb.mxu2 %v736_v9 }
   0xf   :  { %172 = vmatpush.msra.mxu3 %v785_v16  ;;  %113 = vmatpush.msra.mxu1 %v790_v17 }
  0x10   :  { %202 = vmatpush.msrb.mxu0 %v697_v2  ;;  %229 = vmatpush.msrb.mxu2 %v741_v10 }
  0x11   :  { %88 = vrot.lane.b32.xlu0 %v51_v8, %s647_s18  ;;  %173 = vmatpush.msra.mxu3 %v790_v17 }
  0x12   :  { %203 = vmatpush.msrb.mxu0 %v705_v3  ;;  %230 = vmatpush.msrb.mxu2 %v770_v14 }
  0x13   :  { %114 = vmatpush.msra.mxu1 %v798_v18  ;;  %174 = vmatpush.msra.mxu3 %v798_v18 }
  0x14   :  { %204 = vmatpush.msrb.mxu0 %v712_v4  ;;  %231 = vmatpush.msrb.mxu2 %v777_v15 }
  0x15   :  { %115 = vmatpush.msra.mxu1 %v806_v19  ;;  %175 = vmatpush.msra.mxu3 %v806_v19 }
  0x16   :  { %205 = vmatpush.msrb.mxu0 %v719_v5  ;;  %232 = vmatpush.msrb.mxu2 %v785_v16 }
  0x17   :  { %261 = vmatpush.msrb.mxu1 %v692_v1  ;;  %288 = vmatpush.msrb.mxu3 %v736_v9 }
  0x18   :  { %206 = vmatpush.msrb.mxu0 %v729_v7  ;;  %233 = vmatpush.msrb.mxu2 %v790_v17 }
  0x19   :  { %262 = vmatpush.msrb.mxu1 %v697_v2  ;;  %289 = vmatpush.msrb.mxu3 %v741_v10 }
  0x1a   :  { %234 = vmatpush.msrb.mxu2 %v798_v18 }
  0x1b   :  { %263 = vmatpush.msrb.mxu1 %v705_v3  ;;  %290 = vmatpush.msrb.mxu3 %v770_v14 }
  0x1c   :  { %235 = vmatpush.msrb.mxu2 %v806_v19 }
  0x1d   :  { %264 = vmatpush.msrb.mxu1 %v712_v4  ;;  %291 = vmatpush.msrb.mxu3 %v777_v15 }
  0x1f   :  { %265 = vmatpush.msrb.mxu1 %v719_v5  ;;  %292 = vmatpush.msrb.mxu3 %v785_v16 }
  0x21   :  { %266 = vmatpush.msrb.mxu1 %v729_v7  ;;  %293 = vmatpush.msrb.mxu3 %v790_v17 }
  0x23   :  { %294 = vmatpush.msrb.mxu3 %v798_v18 }
  0x25   :  { %295 = vmatpush.msrb.mxu3 %v806_v19 }
  0x7b   :  { %v55_v12 = vpop.permute.xlu0 %54 }
  0x7c   :  { %v58_v13 = vsel %vm57_vm1, %v52_v11, %v55_v12 }
  0x7d   :  { %583 = vmatmul.msk.f32.vlgmr.msra.gmra.mxu0 %vm62_vm2, %v58_v13 }
  0x7e   :  { %321 = vmatpush.msra.mxu0 %v692_v1 }
  0x80   :  { %322 = vmatpush.msra.mxu0 %v697_v2 }
  0x82   :  { %323 = vmatpush.msra.mxu0 %v705_v3 }
  0x83   :  { %v89_v23 = vpop.permute.xlu0 %88 }
  0x84   :  { %324 = vmatpush.msra.mxu0 %v712_v4 }
  0x86   :  { %325 = vmatpush.msra.mxu0 %v719_v5 }
  0x88   :  { %326 = vmatpush.msra.mxu0 %v729_v7 }
  0xfa   :  { %v83_v21 = vpop.f32.mrf.mxu0 }
  0xfb   :  { %v84_v22 = vadd.f32 %v832_v20, %v83_v21 }
  0xfd   :  { %613 = vtanh.f32 %v84_v22 }
 0x103   :  { %v614_v24 = vpop.eup %613 }
 0x104   :  { %124 = vrot.lane.b32.xlu1 %v614_v24, %s646_s11  ;;  %v92_v25 = vsel %vm30_vm0, %v614_v24, %v89_v23 }
 0x105   :  { %584 = vmatmul.msk.f32.vlgmr.msra.gmra.mxu1 %vm96_vm3, %v92_v25 }
 0x106   :  { %348 = vmatpush.msra.mxu1 %v736_v9 }
 0x108   :  { %349 = vmatpush.msra.mxu1 %v741_v10 }
 0x10a   :  { %350 = vmatpush.msra.mxu1 %v770_v14 }
 0x10c   :  { %351 = vmatpush.msra.mxu1 %v777_v15 }
 0x10e   :  { %352 = vmatpush.msra.mxu1 %v785_v16 }
 0x110   :  { %353 = vmatpush.msra.mxu1 %v790_v17 }
 0x112   :  { %354 = vmatpush.msra.mxu1 %v798_v18 }
 0x114   :  { %355 = vmatpush.msra.mxu1 %v806_v19 }
 0x176   :  { %v125_v27 = vpop.permute.xlu1 %124 }
 0x177   :  { %v127_v28 = vsel %vm57_vm1, %v585_v26, %v125_v27 }
 0x178   :  { %586 = vmatmul.msk.f32.vlgmr.msra.gmra.mxu2 %vm62_vm2, %v127_v28 }
 0x179   :  { %381 = vmatpush.msra.mxu2 %v692_v1 }
 0x17b   :  { %382 = vmatpush.msra.mxu2 %v697_v2 }
 0x17d   :  { %383 = vmatpush.msra.mxu2 %v705_v3 }
 0x17f   :  { %384 = vmatpush.msra.mxu2 %v712_v4 }
 0x181   :  { %385 = vmatpush.msra.mxu2 %v719_v5 }
 0x182   :  { %v117_v30 = vpop.f32.mrf.mxu1 }
 0x183   :  { %v118_v31 = vadd.f32 %v857_v29, %v117_v30  ;;  %386 = vmatpush.msra.mxu2 %v729_v7 }
 0x185   :  { %615 = vtanh.f32 %v118_v31  ;;  %v603_v31 = vld [vmem:[%s994_s0 + $0x38] sm:$0xff] }
 0x18b   :  { %v616_v32 = vpop.eup %615 }
 0x18c   :  { %153 = vrot.lane.b32.xlu1 %v616_v32, %s647_s18 }
 0x1fb   :  { %v148_v33 = vpop.f32.mrf.mxu2 }
 0x1fc   :  { %v149_v34 = vadd.f32 %v832_v20, %v148_v33 }
 0x1fe   :  { %617 = vtanh.f32 %v149_v34  ;;  %v154_v36 = vpop.permute.xlu1 %153 }
 0x204   :  { %v618_v35 = vpop.eup %617 }
 0x205   :  { %184 = vrot.lane.b32.xlu2 %v618_v35, %s646_s11  ;;  %v156_v37 = vsel %vm30_vm0, %v618_v35, %v154_v36 }
 0x206   :  { %587 = vmatmul.msk.f32.vlgmr.msra.gmra.mxu3 %vm96_vm3, %v156_v37 }
 0x207   :  { %408 = vmatpush.msra.mxu3 %v736_v9 }
 0x209   :  { %409 = vmatpush.msra.mxu3 %v741_v10 }
 0x20b   :  { %410 = vmatpush.msra.mxu3 %v770_v14 }
 0x20d   :  { %411 = vmatpush.msra.mxu3 %v777_v15 }
 0x20f   :  { %412 = vmatpush.msra.mxu3 %v785_v16 }
 0x211   :  { %413 = vmatpush.msra.mxu3 %v790_v17 }
 0x213   :  { %414 = vmatpush.msra.mxu3 %v798_v18 }
 0x215   :  { %415 = vmatpush.msra.mxu3 %v806_v19 }
 0x25f   :  { %v185_v39 = vpop.permute.xlu2 %184 }
 0x260   :  { %v187_v40 = vsel %vm57_vm1, %v588_v38, %v185_v39 }
 0x261   :  { %589 = vmatmul.msk.f32.vlgmr.msrb.gmra.mxu0 %vm62_vm2, %v187_v40 }
 0x262   :  { %441 = vmatpush.msrb.mxu0 %v692_v1 }
 0x264   :  { %442 = vmatpush.msrb.mxu0 %v697_v2 }
 0x266   :  { %443 = vmatpush.msrb.mxu0 %v705_v3 }
 0x268   :  { %444 = vmatpush.msrb.mxu0 %v712_v4 }
 0x26a   :  { %445 = vmatpush.msrb.mxu0 %v719_v5 }
 0x26c   :  { %446 = vmatpush.msrb.mxu0 %v729_v7 }
 0x289   :  { %v177_v41 = vpop.f32.mrf.mxu3 }
 0x28a   :  { %v178_v42 = vadd.f32 %v857_v29, %v177_v41 }
 0x28c   :  { %619 = vtanh.f32 %v178_v42  ;;  %v549_v42 = vld [vmem:[%s997_s5 + $0x18] sm:$0xff] }
 0x292   :  { %v620_v43 = vpop.eup %619 }
 0x293   :  { %213 = vrot.lane.b32.xlu2 %v620_v43, %s647_s18  ;;  %v548_v43 = vld [vmem:[%s997_s5 + $0x10] sm:$0xff] }
 0x2de   :  { %v208_v44 = vpop.f32.mrf.mxu0 }
 0x2df   :  { %v209_v45 = vadd.f32 %v832_v20, %v208_v44  ;;  %v546_v44 = vld [vmem:[%s997_s5] sm:$0xff] }
 0x2e1   :  { %621 = vtanh.f32 %v209_v45 }
 0x2e7   :  { %v622_v46 = vpop.eup %621 }
 0x2e8   :  { %244 = vrot.lane.b32.xlu0 %v622_v46, %s646_s11 }
 0x2ed   :  { %v214_v47 = vpop.permute.xlu2 %213 }
 0x2ee   :  { %v216_v48 = vsel %vm30_vm0, %v622_v46, %v214_v47 }
 0x2ef   :  { %590 = vmatmul.msk.f32.vlgmr.msrb.gmra.mxu2 %vm96_vm3, %v216_v48  ;;  %v612_v48 = vld [vmem:[%s996_s6] ss:$0 sm:$0xff] }
 0x2f0   :  { %468 = vmatpush.msrb.mxu2 %v736_v9 }
 0x2f2   :  { %469 = vmatpush.msrb.mxu2 %v741_v10 }
 0x2f4   :  { %470 = vmatpush.msrb.mxu2 %v770_v14 }
 0x2f6   :  { %471 = vmatpush.msrb.mxu2 %v777_v15 }
 0x2f8   :  { %472 = vmatpush.msrb.mxu2 %v785_v16 }
 0x2fa   :  { %473 = vmatpush.msrb.mxu2 %v790_v17 }
 0x2fc   :  { %474 = vmatpush.msrb.mxu2 %v798_v18 }
 0x2fe   :  { %475 = vmatpush.msrb.mxu2 %v806_v19 }
 0x35a   :  { %v245_v50 = vpop.permute.xlu0 %244 }
 0x35b   :  { %v247_v51 = vsel %vm57_vm1, %v591_v49, %v245_v50 }
 0x35c   :  { %592 = vmatmul.msk.f32.vlgmr.msrb.gmra.mxu1 %vm62_vm2, %v247_v51 }
 0x35d   :  { %501 = vmatpush.msrb.mxu1 %v692_v1 }
 0x35f   :  { %502 = vmatpush.msrb.mxu1 %v697_v2 }
 0x361   :  { %503 = vmatpush.msrb.mxu1 %v705_v3 }
 0x363   :  { %504 = vmatpush.msrb.mxu1 %v712_v4 }
 0x365   :  { %505 = vmatpush.msrb.mxu1 %v719_v5 }
 0x367   :  { %506 = vmatpush.msrb.mxu1 %v729_v7  ;;  %v597_v7 = vld [vmem:[%s994_s0 + $0x28] sm:$0xff] }
 0x372   :  { %v237_v52 = vpop.f32.mrf.mxu2 }
 0x373   :  { %v238_v53 = vadd.f32 %v857_v29, %v237_v52 }
 0x375   :  { %623 = vtanh.f32 %v238_v53 }
 0x37b   :  { %v624_v54 = vpop.eup %623 }
 0x37c   :  { %273 = vrot.lane.b32.xlu1 %v624_v54, %s647_s18 }
 0x3d9   :  { %v268_v55 = vpop.f32.mrf.mxu1 }
 0x3da   :  { %v269_v56 = vadd.f32 %v832_v20, %v268_v55 }
 0x3dc   :  { %625 = vtanh.f32 %v269_v56 }
 0x3e2   :  { %v626_v57 = vpop.eup %625 }
 0x3e3   :  { %304 = vrot.lane.b32.xlu2 %v626_v57, %s646_s11 }
 0x3ee   :  { %v274_v58 = vpop.permute.xlu1 %273 }
 0x3ef   :  { %v276_v59 = vsel %vm30_vm0, %v626_v57, %v274_v58 }
 0x3f0   :  { %593 = vmatmul.msk.f32.vlgmr.msrb.gmra.mxu3 %vm96_vm3, %v276_v59 }
 0x3f1   :  { %569 = vmatpush.msrb.mxu3 %v549_v42 }
 0x3f3   :  { %570 = vmatpush.msrb.mxu3 %v548_v43 }
 0x43d   :  { %v305_v61 = vpop.permute.xlu2 %304 }
 0x43e   :  { %v307_v62 = vsel %vm57_vm1, %v594_v60, %v305_v61 }
 0x43f   :  { %595 = vmatmul.msk.f32.vlgmr.msra.gmra.mxu0 %vm62_vm2, %v307_v62 }
 0x440   :  { %528 = vmatpush.msra.mxu0 %v736_v9 }
 0x442   :  { %529 = vmatpush.msra.mxu0 %v741_v10 }
 0x444   :  { %530 = vmatpush.msra.mxu0 %v770_v14 }
 0x446   :  { %531 = vmatpush.msra.mxu0 %v777_v15 }
 0x448   :  { %532 = vmatpush.msra.mxu0 %v785_v16 }
 0x44a   :  { %533 = vmatpush.msra.mxu0 %v790_v17 }
 0x44c   :  { %534 = vmatpush.msra.mxu0 %v798_v18  ;;  %v600_v18 = vld [vmem:[%s994_s0 + $0x30] sm:$0xff] }
 0x44e   :  { %535 = vmatpush.msra.mxu0 %v806_v19 }
 0x473   :  { %v297_v63 = vpop.f32.mrf.mxu3 }
 0x474   :  { %v298_v0 = vadd.f32 %v857_v29, %v297_v63 }
 0x476   :  { %627 = vtanh.f32 %v298_v0 }
 0x47c   :  { %v628_v1 = vpop.eup %627 }
 0x47d   :  { %333 = vrot.lane.b32.xlu0 %v628_v1, %s647_s18 }
 0x4bc   :  { %v328_v2 = vpop.f32.mrf.mxu0 }
 0x4bd   :  { %v329_v3 = vadd.f32 %v832_v20, %v328_v2 }
 0x4bf   :  { %629 = vtanh.f32 %v329_v3 }
 0x4c5   :  { %v630_v4 = vpop.eup %629 }
 0x4c6   :  { %364 = vrot.lane.b32.xlu1 %v630_v4, %s646_s11 }
 0x4ef   :  { %v334_v5 = vpop.permute.xlu0 %333 }
 0x4f0   :  { %v336_v6 = vsel %vm30_vm0, %v630_v4, %v334_v5 }
 0x4f1   :  { %596 = vmatmul.msk.f32.vlgmr.msra.gmra.mxu1 %vm96_vm3, %v336_v6 }
 0x538   :  { %v365_v8 = vpop.permute.xlu1 %364 }
 0x539   :  { %v367_v9 = vsel %vm57_vm1, %v597_v7, %v365_v8 }
 0x53a   :  { %598 = vmatmul.msk.f32.vlgmr.msra.gmra.mxu2 %vm62_vm2, %v367_v9 }
 0x56e   :  { %v357_v10 = vpop.f32.mrf.mxu1 }
 0x56f   :  { %v358_v11 = vadd.f32 %v857_v29, %v357_v10 }
 0x571   :  { %631 = vtanh.f32 %v358_v11 }
 0x577   :  { %v632_v12 = vpop.eup %631 }
 0x578   :  { %393 = vrot.lane.b32.xlu2 %v632_v12, %s647_s18 }
 0x5bd   :  { %v388_v13 = vpop.f32.mrf.mxu2 }
 0x5be   :  { %v389_v14 = vadd.f32 %v832_v20, %v388_v13 }
 0x5c0   :  { %633 = vtanh.f32 %v389_v14 }
 0x5c6   :  { %v634_v15 = vpop.eup %633 }
 0x5c7   :  { %424 = vrot.lane.b32.xlu0 %v634_v15, %s646_s11 }
 0x5d2   :  { %v394_v16 = vpop.permute.xlu2 %393 }
 0x5d3   :  { %v396_v17 = vsel %vm30_vm0, %v634_v15, %v394_v16 }
 0x5d4   :  { %599 = vmatmul.msk.f32.vlgmr.msra.gmra.mxu3 %vm96_vm3, %v396_v17 }
 0x639   :  { %v425_v19 = vpop.permute.xlu0 %424 }
 0x63a   :  { %v427_v21 = vsel %vm57_vm1, %v600_v18, %v425_v19 }
 0x63b   :  { %601 = vmatmul.msk.f32.vlgmr.msrb.gmra.mxu0 %vm62_vm2, %v427_v21 }
 0x657   :  { %v417_v22 = vpop.f32.mrf.mxu3 }
 0x658   :  { %v418_v23 = vadd.f32 %v857_v29, %v417_v22 }
 0x65a   :  { %635 = vtanh.f32 %v418_v23 }
 0x660   :  { %v636_v24 = vpop.eup %635 }
 0x661   :  { %453 = vrot.lane.b32.xlu1 %v636_v24, %s647_s18 }
 0x6b8   :  { %v448_v25 = vpop.f32.mrf.mxu0 }
 0x6b9   :  { %v449_v26 = vadd.f32 %v832_v20, %v448_v25 }
 0x6bb   :  { %637 = vtanh.f32 %v449_v26 }
 0x6c1   :  { %v638_v27 = vpop.eup %637 }
 0x6c2   :  { %484 = vrot.lane.b32.xlu2 %v638_v27, %s646_s11 }
 0x6d3   :  { %v454_v28 = vpop.permute.xlu1 %453 }
 0x6d4   :  { %v456_v30 = vsel %vm30_vm0, %v638_v27, %v454_v28 }
 0x6d5   :  { %602 = vmatmul.msk.f32.vlgmr.msrb.gmra.mxu2 %vm96_vm3, %v456_v30 }
 0x71c   :  { %v485_v32 = vpop.permute.xlu2 %484 }
 0x71d   :  { %v487_v33 = vsel %vm57_vm1, %v603_v31, %v485_v32 }
 0x71e   :  { %604 = vmatmul.msk.f32.vlgmr.msrb.gmra.mxu1 %vm62_vm2, %v487_v33 }
 0x758   :  { %v477_v34 = vpop.f32.mrf.mxu2 }
 0x759   :  { %v478_v35 = vadd.f32 %v857_v29, %v477_v34 }
 0x75b   :  { %639 = vtanh.f32 %v478_v35 }
 0x761   :  { %v640_v36 = vpop.eup %639 }
 0x762   :  { %513 = vrot.lane.b32.xlu0 %v640_v36, %s647_s18 }
 0x79b   :  { %v508_v37 = vpop.f32.mrf.mxu1 }
 0x79c   :  { %v509_v38 = vadd.f32 %v832_v20, %v508_v37  ;;  %v547_v20 = vld [vmem:[%s997_s5 + $0x8] sm:$0xff] }
 0x79d   :  { %571 = vmatpush.msrb.mxu3 %v547_v20 }
 0x79e   :  { %641 = vtanh.f32 %v509_v38 }
 0x79f   :  { %572 = vmatpush.msrb.mxu3 %v546_v44 }
 0x7a4   :  { %v642_v39 = vpop.eup %641 }
 0x7a5   :  { %541 = vst.msk [vmem:[#allocation2] sm:$0xff] %vm30_vm0, %v642_v39 }
 0x7d4   :  { %v514_v40 = vpop.permute.xlu0 %513 }
 0x7d5   :  { %v516_v41 = vsel %vm30_vm0, %v642_v39, %v514_v40 }
 0x7d6   :  { %605 = vmatmul.msk.f32.vlgmr.msra.gmra.mxu0 %vm96_vm3, %v516_v41 }
 0x853   :  { %v537_v45 = vpop.f32.mrf.mxu0 }
 0x854   :  { %v538_v46 = vadd.f32 %v857_v29, %v537_v45 }
 0x856   :  { %643 = vtanh.f32 %v538_v46 }
 0x85c   :  { %v644_v47 = vpop.eup %643 }
 0x85d   :  { %542 = vst.msk [vmem:[#allocation2 + $0x8] sm:$0xff] %vm30_vm0, %v644_v47  ;;  %606 = vmatmul.msk.f32.vlgmr.msrb.gmra.mxu3 %vm30_vm0, %v644_v47 }
 0x8e0   :  { %v574_v49 = vpop.f32.mrf.mxu3 }
 0x8e1   :  { %v575_v50 = vadd.f32 %v612_v48, %v574_v49 }
 0x8e3   :  { %578 = vst.msk [vmem:[%s998_s7] sm:$0xff] %vm577_vm4, %v575_v50 }

</bundles_post_ra>
